<compile_context>
chip_gen: v7x
topology: tpu7x:2x2x1
jax: 0.10.0
libtpu: 0.0.40
codegen_flags: <defaults>
</compile_context>

<pallas_src>
import jax
import jax.numpy as jnp
from jax.experimental import pallas as pl
from jax.experimental.pallas import tpu as pltpu


def _round_up(n, m):
    return ((n + m - 1) // m) * m


def _cdiv(a, b):
    return -(-a // b)


def _block_diag(w, fold):
    """(din, dout) -> (fold*din, fold*dout) block-diagonal replication of w."""
    if fold == 1:
        return w
    din, dout = w.shape
    eye = jnp.eye(fold, dtype=w.dtype)
    return (eye[:, None, :, None] * w[None, :, None, :]).reshape(fold * din, fold * dout)


def ffn_kernel(x_ref, w1_ref, b1_ref, w2_ref, b2_ref, o_ref):
    x = x_ref[...]                          # (rt, Ef) in the I/O dtype (f32 here)
    xm = x.astype(w1_ref.dtype)             # no-op for f32 weights; bf16 cast otherwise
    # fc1 + ReLU (dropout is identity at inference)
    h = jnp.dot(xm, w1_ref[...], preferred_element_type=jnp.float32) + b1_ref[...]
    h = jnp.maximum(h, 0.0)
    # fc2
    out = jnp.dot(h.astype(w2_ref.dtype), w2_ref[...],
                  preferred_element_type=jnp.float32) + b2_ref[...]
    # add_identity=True, identity defaults to x (x already in compute dtype)
    o_ref[...] = (x + out).astype(o_ref.dtype)


def ffn_pallas(x, w1, b1, w2, b2, *, row_tile=8192, lane_target=128,
               bf16_matmul=False):
    """x: (B, S, E).  w1: (E, F), b1: (F,), w2: (F, E), b2: (E,)."""
    B, S, E = x.shape
    F = w1.shape[1]
    N = B * S

    # --- lane fold: pack `fold` tokens into the 128-lane dimension ------------
    if E < lane_target and lane_target % E == 0:
        fold = lane_target // E
    else:
        fold = 1
    Ef, Ff = fold * E, fold * F

    x2 = x.reshape(N, E)
    Np = _round_up(N, fold)
    if Np != N:
        # Tiny pad so the token count is a multiple of the fold; padded rows are
        # computed but sliced off below (rows never interact).
        x2 = jnp.pad(x2, ((0, Np - N), (0, 0)))
    n_rows = Np // fold
    xf = x2.reshape(n_rows, Ef)

    wdtype = jnp.bfloat16 if bf16_matmul else w1.dtype
    w1_bd = _block_diag(w1, fold).astype(wdtype)      # (Ef, Ff)
    w2_bd = _block_diag(w2, fold).astype(wdtype)      # (Ff, Ef)
    b1_f = jnp.tile(b1, fold).reshape(1, Ff).astype(jnp.float32)
    b2_f = jnp.tile(b2, fold).reshape(1, Ef).astype(jnp.float32)

    # --- row tiling (in folded rows) ------------------------------------------
    # Big tiles to amortize the ~0.35us/step overhead; capped at ceil(rows/2)
    # so the parallel grid has >= 2 blocks (keeps both v7x TCs busy) and at the
    # (rounded) row count so tiny problems stay a single partial block.
    rt = _round_up(max(8, row_tile // fold), 8)
    rt = min(rt, _round_up(_cdiv(n_rows, 2), 8))
    rt = max(8, min(rt, _round_up(n_rows, 8)))
    grid = _cdiv(n_rows, rt)

    # Advisory cost (logical, not block-diagonal): two matmuls + stream x/out.
    flops = 4 * N * E * F
    bytes_accessed = 4 * (2 * N * E + E * F + F + F * E + E)

    out = pl.pallas_call(
        ffn_kernel,
        out_shape=jax.ShapeDtypeStruct((n_rows, Ef), x.dtype),
        grid_spec=pltpu.PrefetchScalarGridSpec(
            num_scalar_prefetch=0,
            grid=(grid,),
            in_specs=[
                pl.BlockSpec((rt, Ef), lambda i: (i, 0)),    # x rows (streamed)
                pl.BlockSpec((Ef, Ff), lambda i: (0, 0)),    # W1 block-diag (resident)
                pl.BlockSpec((1, Ff), lambda i: (0, 0)),     # b1 (resident)
                pl.BlockSpec((Ff, Ef), lambda i: (0, 0)),    # W2 block-diag (resident)
                pl.BlockSpec((1, Ef), lambda i: (0, 0)),     # b2 (resident)
            ],
            out_specs=pl.BlockSpec((rt, Ef), lambda i: (i, 0)),
        ),
        compiler_params=pltpu.CompilerParams(
            dimension_semantics=("parallel",),
            vmem_limit_bytes=32 * 1024 * 1024),
        cost_estimate=pl.CostEstimate(
            flops=flops, transcendentals=0, bytes_accessed=bytes_accessed),
    )(xf, w1_bd, b1_f, w2_bd, b2_f)

    out = out.reshape(Np, E)
    if Np != N:
        out = out[:N]
    return out.reshape(B, S, E)


def ffn_reference(x, w1, b1, w2, b2):
    h = jnp.maximum(x @ w1 + b1, 0.0)
    return x + (h @ w2 + b2)


if __name__ == "__main__":
    # Shapes consistent with the defor_encoder FFN config: embed_dims=32, ff=64.
    E, F = 32, 64

    key = jax.random.PRNGKey(0)
    kx, k1, k2, k3, k4, kx2, kx3 = jax.random.split(key, 7)

    # Deterministic synthetic parameters (no checkpoint load).
    w1 = jax.random.normal(k1, (E, F), dtype=jnp.float32) * 0.05
    b1 = jax.random.normal(k2, (F,), dtype=jnp.float32) * 0.05
    w2 = jax.random.normal(k3, (F, E), dtype=jnp.float32) * 0.05
    b2 = jax.random.normal(k4, (E,), dtype=jnp.float32) * 0.05

    # Case 1: tiny, fold-aligned token count (N = 16).
    x = jax.random.normal(kx, (2, 8, E), dtype=jnp.float32)
    out = jax.block_until_ready(ffn_pallas(x, w1, b1, w2, b2))
    ref = ffn_reference(x, w1, b1, w2, b2)
    assert out.shape == x.shape
    assert jnp.allclose(out, ref, atol=1e-5, rtol=1e-5), "mismatch (aligned)"

    # Case 2: ragged token count (N = 30, not a multiple of the 4-token fold).
    x_r = jax.random.normal(kx2, (3, 10, E), dtype=jnp.float32)
    out_r = jax.block_until_ready(ffn_pallas(x_r, w1, b1, w2, b2))
    ref_r = ffn_reference(x_r, w1, b1, w2, b2)
    assert out_r.shape == x_r.shape
    assert jnp.allclose(out_r, ref_r, atol=1e-5, rtol=1e-5), "mismatch (ragged)"

    # Case 3: enough tokens that the grid has >= 2 blocks (multi-step pipeline).
    x_m = jax.random.normal(kx3, (4, 1024, E), dtype=jnp.float32)
    out_m = jax.block_until_ready(ffn_pallas(x_m, w1, b1, w2, b2))
    ref_m = ffn_reference(x_m, w1, b1, w2, b2)
    assert jnp.allclose(out_m, ref_m, atol=1e-5, rtol=1e-5), "mismatch (grid>1)"

    # Case 4: bf16 MXU operands, f32 accumulate/residual (looser tolerance).
    out_bf = jax.block_until_ready(
        ffn_pallas(x_m, w1, b1, w2, b2, bf16_matmul=True))
    assert jnp.allclose(out_bf, ref_m, atol=3e-2, rtol=3e-2), "mismatch (bf16)"

    # TODO(synk): nn.Dropout layers are identity in eval mode; training-mode
    # stochastic dropout would use pltpu.prng_seed/prng_random_bits.
    print("KERNEL_OK")
</pallas_src>

<mosaic_0001>
module attributes {stable_mosaic.version = 11 : i64} {
  func.func @ffn_kernel(%arg0: i32, %arg1: memref<8x128xf32, #tpu.memory_space<vmem>>, %arg2: memref<128x256xf32, #tpu.memory_space<vmem>>, %arg3: memref<1x256xf32, #tpu.memory_space<vmem>>, %arg4: memref<256x128xf32, #tpu.memory_space<vmem>>, %arg5: memref<1x128xf32, #tpu.memory_space<vmem>>, %arg6: memref<8x128xf32, #tpu.memory_space<vmem>>) attributes {dimension_semantics = [#tpu.dimension_semantics<parallel>], iteration_bounds = array<i64: 1>, scalar_prefetch = 0 : i64, scratch_operands = 0 : i64, tpu.core_type = #tpu.core_type<tc>, window_params = [{transform_indices = @transform_0, window_bounds = array<i64: 8, 128>}, {pipeline_mode = #tpu.pipeline_mode<synchronous>, transform_indices = @transform_1, window_bounds = array<i64: 128, 256>}, {pipeline_mode = #tpu.pipeline_mode<synchronous>, transform_indices = @transform_2, window_bounds = array<i64: 1, 256>}, {pipeline_mode = #tpu.pipeline_mode<synchronous>, transform_indices = @transform_3, window_bounds = array<i64: 256, 128>}, {pipeline_mode = #tpu.pipeline_mode<synchronous>, transform_indices = @transform_4, window_bounds = array<i64: 1, 128>}, {transform_indices = @transform_5, window_bounds = array<i64: 8, 128>}]} {
    %c0 = arith.constant 0 : index
    %c0_0 = arith.constant 0 : index
    %0 = vector.load %arg1[%c0, %c0_0] : memref<8x128xf32, #tpu.memory_space<vmem>>, vector<8x128xf32>
    %c0_1 = arith.constant 0 : index
    %c0_2 = arith.constant 0 : index
    %1 = vector.load %arg2[%c0_1, %c0_2] : memref<128x256xf32, #tpu.memory_space<vmem>>, vector<128x256xf32>
    %cst = arith.constant dense<0.000000e+00> : vector<8x256xf32>
    %2 = tpu.matmul %0, %1, %cst {dimension_numbers = #tpu.dot_dimension_numbers<[1], [0], [0], [1], [0, 0, 1, 1], [], []>} : vector<8x128xf32>, vector<128x256xf32>, vector<8x256xf32> -> vector<8x256xf32>
    %c0_3 = arith.constant 0 : index
    %c0_4 = arith.constant 0 : index
    %3 = vector.load %arg3[%c0_3, %c0_4] : memref<1x256xf32, #tpu.memory_space<vmem>>, vector<1x256xf32>
    %4 = vector.broadcast %3 : vector<1x256xf32> to vector<8x256xf32>
    %5 = arith.addf %2, %4 : vector<8x256xf32>
    %cst_5 = arith.constant 0.000000e+00 : f32
    %6 = vector.broadcast %cst_5 : f32 to vector<8x256xf32>
    %7 = arith.maximumf %5, %6 : vector<8x256xf32>
    %c0_6 = arith.constant 0 : index
    %c0_7 = arith.constant 0 : index
    %8 = vector.load %arg4[%c0_6, %c0_7] : memref<256x128xf32, #tpu.memory_space<vmem>>, vector<256x128xf32>
    %cst_8 = arith.constant dense<0.000000e+00> : vector<8x128xf32>
    %9 = tpu.matmul %7, %8, %cst_8 {dimension_numbers = #tpu.dot_dimension_numbers<[1], [0], [0], [1], [0, 0, 1, 1], [], []>} : vector<8x256xf32>, vector<256x128xf32>, vector<8x128xf32> -> vector<8x128xf32>
    %c0_9 = arith.constant 0 : index
    %c0_10 = arith.constant 0 : index
    %10 = vector.load %arg5[%c0_9, %c0_10] : memref<1x128xf32, #tpu.memory_space<vmem>>, vector<1x128xf32>
    %11 = vector.broadcast %10 : vector<1x128xf32> to vector<8x128xf32>
    %12 = arith.addf %9, %11 : vector<8x128xf32>
    %13 = arith.addf %0, %12 : vector<8x128xf32>
    %c0_11 = arith.constant 0 : index
    %c0_12 = arith.constant 0 : index
    %14 = vector.load %arg6[%c0_11, %c0_12] : memref<8x128xf32, #tpu.memory_space<vmem>>, vector<8x128xf32>
    tpu.vector_store %arg6[%c0_11, %c0_12], %13 {strides = array<i32>} : memref<8x128xf32, #tpu.memory_space<vmem>>, vector<8x128xf32>,
    return
  }
  func.func @transform_0(%arg0: i32) -> (i32, i32) {
    %c0_i32 = arith.constant 0 : i32
    %c0_i32_0 = arith.constant 0 : i32
    return %arg0, %c0_i32 : i32, i32
  }
  func.func @transform_1(%arg0: i32) -> (i32, i32) {
    %c0_i32 = arith.constant 0 : i32
    %c0_i32_0 = arith.constant 0 : i32
    %c0_i32_1 = arith.constant 0 : i32
    return %c0_i32, %c0_i32_0 : i32, i32
  }
  func.func @transform_2(%arg0: i32) -> (i32, i32) {
    %c0_i32 = arith.constant 0 : i32
    %c0_i32_0 = arith.constant 0 : i32
    %c0_i32_1 = arith.constant 0 : i32
    return %c0_i32, %c0_i32_0 : i32, i32
  }
  func.func @transform_3(%arg0: i32) -> (i32, i32) {
    %c0_i32 = arith.constant 0 : i32
    %c0_i32_0 = arith.constant 0 : i32
    %c0_i32_1 = arith.constant 0 : i32
    return %c0_i32, %c0_i32_0 : i32, i32
  }
  func.func @transform_4(%arg0: i32) -> (i32, i32) {
    %c0_i32 = arith.constant 0 : i32
    %c0_i32_0 = arith.constant 0 : i32
    %c0_i32_1 = arith.constant 0 : i32
    return %c0_i32, %c0_i32_0 : i32, i32
  }
  func.func @transform_5(%arg0: i32) -> (i32, i32) {
    %c0_i32 = arith.constant 0 : i32
    %c0_i32_0 = arith.constant 0 : i32
    return %arg0, %c0_i32 : i32, i32
  }
}

</mosaic_0001>

<bundles_post_ra>
// kernel: tpu_custom_call.1
= control target key start
LH: loop header
LB: loop body
LE: loop exit
PB: predicated region body
PF: predicated region fallthrough
CT: control target
= control target key end

     0   :  { %10 = vsyncpa [#allocation3], 0  ;;  %s615_s0 = inlined_call_operand.hbm [shape: f32[4,128], index: 0, kind: input, shape index: {}]   ;;  %s616_s1 = inlined_call_operand.hbm [shape: f32[128,256], index: 1, kind: input, shape index: {}]   ;;  %s617_s2 = inlined_call_operand.vmem [shape: f32[1,256], index: 2, kind: input, shape index: {}]   ;;  %s618_s3 = inlined_call_operand.hbm [shape: f32[256,128], index: 3, kind: input, shape index: {}]   ;;  %s619_s4 = inlined_call_operand.vmem [shape: f32[1,128], index: 4, kind: input, shape index: {}]   ;;  %s620_s5 = inlined_call_operand.hbm [shape: f32[4,128], index: 5, kind: output, shape index: {}]  }
   0x1   :  { %11 = vsyncpa [#allocation6], 0 }
   0x2   :  { %12 = vsyncpa [#allocation4], 0 }
   0x3   :  { %17 = vsyncadd [#allocation3], 64  ;;  %s514_s18 = smov [#allocation5]   ;;  %s420_s22 = scalar_lea.hbm %s616_s1, 4096 }
   0x4   :  { %s30_s19 = sshll.u32 %s514_s18, 4  ;;  %p421_p0 = scmp.ne.s32.totalorder %s616_s1, %s420_s22  ;;  %s31_s19 = int_to_ptr.vmem [resolvable:$true] %s30_s19 }
   0x5   :  { %p424_p1 = scmp.lt.u32.totalorder %s420_s22, %s616_s1 }
   0x7   :  { %p426_p2 = pnand %p424_p1, %p421_p0 }
   0x9   :  { %429 = shalt.err (!%p426_p2)
}
   0xa   :  { %s430_s27 = scalar_lea.vmem %s31_s19, 4096  ;;  %p435_p4 = scmp.lt.s32.totalorder %s31_s19, %s31_s19 }
   0xb   :  { %p431_p3 = scmp.ne.s32.totalorder %s31_s19, %s430_s27  ;;  %p436_p5 = scmp.lt.s32.totalorder %s430_s27, %s430_s27 }
   0xd   :  { %p437_p6 = por %p436_p5, %p435_p4 }
   0xf   :  { %p438_p7 = pnand %p437_p6, %p431_p3 }
  0x11   :  { %441 = shalt.err (!%p438_p7)
}
  0x12   :  { %s515_s28 = smov 256   ;;  %s516_s29 = smov 16  }
  0x13   :  { %36 = dma.hbm_to_vmem [thread:$0]  %s616_s1, 4096, %s31_s19, [#allocation6], %s515_s28, %s515_s28, %s516_s29  }
  0x14   :  { %s517_s7 = smov [#allocation2]   ;;  %s442_s11 = scalar_lea.hbm %s615_s0, 64 }
  0x15   :  { %s18_s8 = sshll.u32 %s517_s7, 4  ;;  %p443_p8 = scmp.ne.s32.totalorder %s615_s0, %s442_s11  ;;  %s19_s8 = int_to_ptr.vmem [resolvable:$true] %s18_s8 }
  0x16   :  { %p446_p9 = scmp.lt.u32.totalorder %s442_s11, %s615_s0 }
  0x18   :  { %p448_p10 = pnand %p446_p9, %p443_p8 }
  0x1a   :  { %451 = shalt.err (!%p448_p10)
}
  0x1b   :  { %s452_s16 = scalar_lea.vmem %s19_s8, 64  ;;  %s456_s1 = scalar_lea.vmem %s19_s8, 128 }
  0x1c   :  { %p453_p11 = scmp.ne.s32.totalorder %s19_s8, %s452_s16  ;;  %p457_p12 = scmp.lt.s32.totalorder %s19_s8, %s19_s8 }
  0x1d   :  { %p458_p13 = scmp.lt.s32.totalorder %s456_s1, %s452_s16 }
  0x1f   :  { %p459_p0 = por %p458_p13, %p457_p12 }
  0x21   :  { %p460_p1 = pnand %p459_p0, %p453_p11 }
  0x23   :  { %463 = shalt.err (!%p460_p1)
}
  0x24   :  { %s518_s17 = smov 64   ;;  %s519_s18 = smov 4  }
  0x25   :  { %24 = dma.hbm_to_vmem [thread:$0]  %s615_s0, 64, %s19_s8, [#allocation3], %s518_s17, %s518_s17, %s519_s18  }
  0x26   :  { %s520_s21 = smov [#allocation7]   ;;  %s464_s25 = scalar_lea.hbm %s618_s3, 4096 }
  0x27   :  { %s44_s22 = sshll.u32 %s520_s21, 4  ;;  %p465_p2 = scmp.ne.s32.totalorder %s618_s3, %s464_s25  ;;  %s45_s22 = int_to_ptr.vmem [resolvable:$true] %s44_s22 }
  0x28   :  { %p468_p3 = scmp.lt.u32.totalorder %s464_s25, %s618_s3 }
  0x2a   :  { %p470_p4 = pnand %p468_p3, %p465_p2 }
  0x2c   :  { %473 = shalt.err (!%p470_p4)
}
  0x2d   :  { %s474_s30 = scalar_lea.vmem %s45_s22, 4096  ;;  %p479_p6 = scmp.lt.s32.totalorder %s45_s22, %s45_s22 }
  0x2e   :  { %p475_p5 = scmp.ne.s32.totalorder %s45_s22, %s474_s30  ;;  %p480_p7 = scmp.lt.s32.totalorder %s474_s30, %s474_s30 }
  0x30   :  { %p481_p8 = por %p480_p7, %p479_p6 }
  0x32   :  { %p482_p9 = pnand %p481_p8, %p475_p5 }
  0x34   :  { %485 = shalt.err (!%p482_p9)
}
  0x35   :  { %s521_s0 = smov 128   ;;  %s522_s6 = smov 8  }
  0x36   :  { %50 = dma.hbm_to_vmem [thread:$0]  %s618_s3, 4096, %s45_s22, [#allocation6], %s521_s0, %s521_s0, %s522_s6  }
  0x37   :  { %508 = dma.done.wait [#allocation3], 128  }
  0x38   :  { %509 = vsyncadd [#allocation3], 4294967168 }
  0x39   :  { %510 = dma.done.wait [#allocation6], 8192  }
  0x3a   :  { %511 = vsyncadd [#allocation6], 4294959104  ;;  %v523_v0 = vmov 0.0   ;;  %v64_v1 = vld [vmem:[#allocation5 + $0x8] sm:$0xff]  ;;  %v66_v2 = vld [vmem:[#allocation5 + $0x18] sm:$0xff] }
  0x3b   :  { %171 = vmatprep.mubr.f32.mxu0 %v523_v0  ;;  %v63_v3 = vld [vmem:[#allocation5] sm:$0xff]  ;;  %v345_v4 = vpack.c.bf16 %v66_v2, %v64_v1  ;;  %v65_v5 = vld [vmem:[#allocation5 + $0x10] sm:$0xff]  ;;  %v68_v6 = vld [vmem:[#allocation5 + $0x28] sm:$0xff] }
  0x3c   :  { %v70_v7 = vld [vmem:[#allocation5 + $0x38] sm:$0xff]  ;;  %v347_v8 = vpack.c.bf16 %v65_v5, %v63_v3  ;;  %v67_v10 = vld [vmem:[#allocation5 + $0x20] sm:$0xff]  ;;  %v69_v11 = vld [vmem:[#allocation5 + $0x30] sm:$0xff] }
  0x3d   :  { %v349_v9 = vpack.c.bf16 %v70_v7, %v68_v6  ;;  %v72_v12 = vld [vmem:[#allocation5 + $0x48] sm:$0xff]  ;;  %346 = vmatprep.subr.bf16.mxu0 %v345_v4  ;;  %v74_v13 = vld [vmem:[#allocation5 + $0x58] sm:$0xff]  ;;  %v351_v14 = vpack.c.bf16 %v69_v11, %v67_v10  ;;  %v71_v16 = vld [vmem:[#allocation5 + $0x40] sm:$0xff] }
  0x3e   :  { %348 = vmatpush1.bf16.msra.mxu0 %v347_v8  ;;  %v353_v15 = vpack.c.bf16 %v74_v13, %v72_v12  ;;  %v73_v17 = vld [vmem:[#allocation5 + $0x50] sm:$0xff]  ;;  %v76_v18 = vld [vmem:[#allocation5 + $0x68] sm:$0xff]  ;;  %v78_v19 = vld [vmem:[#allocation5 + $0x78] sm:$0xff] }
  0x3f   :  { %350 = vmatprep.subr.bf16.mxu0 %v349_v9  ;;  %v355_v20 = vpack.c.bf16 %v73_v17, %v71_v16  ;;  %v357_v21 = vpack.c.bf16 %v78_v19, %v76_v18  ;;  %v75_v22 = vld [vmem:[#allocation5 + $0x60] sm:$0xff]  ;;  %v77_v23 = vld [vmem:[#allocation5 + $0x70] sm:$0xff]  ;;  %v80_v24 = vld [vmem:[#allocation5 + $0x88] sm:$0xff] }
  0x40   :  { %v82_v25 = vld [vmem:[#allocation5 + $0x98] sm:$0xff]  ;;  %v79_v26 = vld [vmem:[#allocation5 + $0x80] sm:$0xff]  ;;  %v81_v27 = vld [vmem:[#allocation5 + $0x90] sm:$0xff]  ;;  %v359_v31 = vpack.c.bf16 %v77_v23, %v75_v22 }
  0x41   :  { %v196_v28 = vld [vmem:[#allocation7 + $0x80] sm:$0xff]  ;;  %v197_v29 = vld [vmem:[#allocation7 + $0x88] sm:$0xff]  ;;  %v198_v34 = vld [vmem:[#allocation7 + $0x90] sm:$0xff]  ;;  %v361_v36 = vpack.c.bf16 %v82_v25, %v80_v24  ;;  %v363_v46 = vpack.c.bf16 %v81_v27, %v79_v26 }
  0x42   :  { %352 = vmatpush1.bf16.msra.mxu0 %v351_v14  ;;  %v180_v30 = vld [vmem:[#allocation7] sm:$0xff]  ;;  %v377_v32 = vpack.c.bf16 %v197_v29, %v196_v28  ;;  %v181_v33 = vld [vmem:[#allocation7 + $0x8] sm:$0xff]  ;;  %v199_v35 = vld [vmem:[#allocation7 + $0x98] sm:$0xff] }
  0x43   :  { %354 = vmatprep.subr.bf16.mxu0 %v353_v15  ;;  %v379_v37 = vpack.c.bf16 %v181_v33, %v180_v30  ;;  %v381_v38 = vpack.c.bf16 %v199_v35, %v198_v34  ;;  %v182_v39 = vld [vmem:[#allocation7 + $0x10] sm:$0xff]  ;;  %v183_v40 = vld [vmem:[#allocation7 + $0x18] sm:$0xff]  ;;  %v200_v41 = vld [vmem:[#allocation7 + $0xa0] sm:$0xff]  ;;  %v97_v34 = vlaneseq }
  0x44   :  { %v84_v42 = vld [vmem:[#allocation5 + $0xa8] sm:$0xff]  ;;  %v86_v43 = vld [vmem:[#allocation5 + $0xb8] sm:$0xff]  ;;  %378 = vmatprep.subr.bf16.mxu1 %v377_v32  ;;  %v383_v45 = vpack.c.bf16 %v183_v40, %v182_v39  ;;  %v83_v47 = vld [vmem:[#allocation5 + $0xa0] sm:$0xff] }
  0x45   :  { %v201_v44 = vld [vmem:[#allocation7 + $0xa8] sm:$0xff]  ;;  %380 = vmatpush3.bf16.msra.mxu1 %v379_v37  ;;  %v184_v49 = vld [vmem:[#allocation7 + $0x20] sm:$0xff]  ;;  %v365_v51 = vpack.c.bf16 %v86_v43, %v84_v42  ;;  %v85_v52 = vld [vmem:[#allocation5 + $0xb0] sm:$0xff]  ;;  %v98_v35 = vshrl.u32 %v97_v34, 7 }
  0x46   :  { %356 = vmatpush1.bf16.msra.mxu0 %v355_v20  ;;  %382 = vmatprep.subr.bf16.mxu1 %v381_v38  ;;  %v385_v48 = vpack.c.bf16 %v201_v44, %v200_v41  ;;  %v185_v50 = vld [vmem:[#allocation7 + $0x28] sm:$0xff]  ;;  %v202_v53 = vld [vmem:[#allocation7 + $0xb0] sm:$0xff]  ;;  %v203_v54 = vld [vmem:[#allocation7 + $0xb8] sm:$0xff]  ;;  %v367_v58 = vpack.c.bf16 %v85_v52, %v83_v47 }
  0x47   :  { %358 = vmatprep.subr.bf16.mxu0 %v357_v21  ;;  %v88_v55 = vld [vmem:[#allocation5 + $0xc8] sm:$0xff]  ;;  %v90_v56 = vld [vmem:[#allocation5 + $0xd8] sm:$0xff]  ;;  %v387_v57 = vpack.c.bf16 %v185_v50, %v184_v49  ;;  %v87_v59 = vld [vmem:[#allocation5 + $0xc0] sm:$0xff]  ;;  %v389_v60 = vpack.c.bf16 %v203_v54, %v202_v53  ;;  %v103_v38 = vsub.s32 1, %v98_v35 }
  0x48   :  { %v186_v61 = vld [vmem:[#allocation7 + $0x30] sm:$0xff]  ;;  %v187_v62 = vld [vmem:[#allocation7 + $0x38] sm:$0xff]  ;;  %v369_v63 = vpack.c.bf16 %v90_v56, %v88_v55  ;;  %v204_v1 = vld [vmem:[#allocation7 + $0xc0] sm:$0xff] }
  0x49   :  { %384 = vmatpush3.bf16.msra.mxu1 %v383_v45  ;;  %v89_v0 = vld [vmem:[#allocation5 + $0xd0] sm:$0xff]  ;;  %v205_v2 = vld [vmem:[#allocation7 + $0xc8] sm:$0xff]  ;;  %v94_v4 = vld [vmem:[#allocation5 + $0xf8] sm:$0xff]  ;;  %v391_v5 = vpack.c.bf16 %v187_v62, %v186_v61 }
  0x4a   :  { %360 = vmatpush1.bf16.msra.mxu0 %v359_v31  ;;  %386 = vmatprep.subr.bf16.mxu1 %v385_v48  ;;  %v92_v3 = vld [vmem:[#allocation5 + $0xe8] sm:$0xff]  ;;  %v371_v6 = vpack.c.bf16 %v89_v0, %v87_v59  ;;  %v91_v7 = vld [vmem:[#allocation5 + $0xe0] sm:$0xff]  ;;  %v393_v8 = vpack.c.bf16 %v205_v2, %v204_v1  ;;  %v93_v12 = vld [vmem:[#allocation5 + $0xf0] sm:$0xff] }
  0x4b   :  { %362 = vmatprep.subr.bf16.mxu0 %v361_v36  ;;  %v188_v9 = vld [vmem:[#allocation7 + $0x40] sm:$0xff]  ;;  %v189_v10 = vld [vmem:[#allocation7 + $0x48] sm:$0xff]  ;;  %v373_v11 = vpack.c.bf16 %v94_v4, %v92_v3  ;;  %v206_v13 = vld [vmem:[#allocation7 + $0xd0] sm:$0xff]  ;;  %v375_v16 = vpack.c.bf16 %v93_v12, %v91_v7  ;;  %v99_v36 = vsub.s32 0, %v98_v35 }
  0x4c   :  { %v207_v14 = vld [vmem:[#allocation7 + $0xd8] sm:$0xff]  ;;  %v395_v15 = vpack.c.bf16 %v189_v10, %v188_v9  ;;  %v190_v18 = vld [vmem:[#allocation7 + $0x50] sm:$0xff]  ;;  %v208_v20 = vld [vmem:[#allocation7 + $0xe0] sm:$0xff] }
  0x4d   :  { %388 = vmatpush3.bf16.msra.mxu1 %v387_v57  ;;  %v397_v17 = vpack.c.bf16 %v207_v14, %v206_v13  ;;  %v191_v19 = vld [vmem:[#allocation7 + $0x58] sm:$0xff]  ;;  %v209_v21 = vld [vmem:[#allocation7 + $0xe8] sm:$0xff]  ;;  %v192_v25 = vld [vmem:[#allocation7 + $0x60] sm:$0xff] }
  0x4e   :  { %364 = vmatpush1.bf16.msra.mxu0 %v363_v46  ;;  %390 = vmatprep.subr.bf16.mxu1 %v389_v60  ;;  %v399_v22 = vpack.c.bf16 %v191_v19, %v190_v18  ;;  %v62_v23 = vld [vmem:[#allocation2] sm:$0xff]  ;;  %v401_v24 = vpack.c.bf16 %v209_v21, %v208_v20  ;;  %v193_v26 = vld [vmem:[#allocation7 + $0x68] sm:$0xff]  ;;  %v210_v28 = vld [vmem:[#allocation7 + $0xf0] sm:$0xff] }
  0x4f   :  { %366 = vmatprep.subr.bf16.mxu0 %v365_v51  ;;  %v403_v27 = vpack.c.bf16 %v193_v26, %v192_v25  ;;  %v211_v29 = vld [vmem:[#allocation7 + $0xf8] sm:$0xff]  ;;  %v194_v31 = vld [vmem:[#allocation7 + $0x70] sm:$0xff] }
  0x50   :  { %v405_v30 = vpack.c.bf16 %v211_v29, %v210_v28  ;;  %v195_v32 = vld [vmem:[#allocation7 + $0x78] sm:$0xff] }
  0x51   :  { %392 = vmatpush3.bf16.msra.mxu1 %v391_v5  ;;  %v407_v33 = vpack.c.bf16 %v195_v32, %v194_v31  ;;  %v95_v37 = vld [vmem:[%s617_s2] sm:$0x3] }
  0x52   :  { %368 = vmatpush1.bf16.msra.mxu0 %v367_v58  ;;  %394 = vmatprep.subr.bf16.mxu1 %v393_v8  ;;  %v100_v39 = vrot.slane %v95_v37, %v99_v36  ;;  %v104_v40 = vrot.slane %v95_v37, %v103_v38  ;;  %v309_v48 = vld [vmem:[%s619_s4] ss:$0 sm:$0xff] }
  0x53   :  { %370 = vmatprep.subr.bf16.mxu0 %v369_v63 }
  0x55   :  { %396 = vmatpush3.bf16.msra.mxu1 %v395_v15 }
  0x56   :  { %372 = vmatpush1.bf16.msra.mxu0 %v371_v6  ;;  %398 = vmatprep.subr.bf16.mxu1 %v397_v17 }
  0x57   :  { %374 = vmatprep.subr.bf16.mxu0 %v373_v11 }
  0x59   :  { %400 = vmatpush3.bf16.msra.mxu1 %v399_v22 }
  0x5a   :  { %376 = vmatpush1.bf16.msra.mxu0 %v375_v16  ;;  %402 = vmatprep.subr.bf16.mxu1 %v401_v24 }
  0x5d   :  { %172 = vmatmul.mubr.f32.vlgmr.msra.gmra.mrb[0].mxu0 %v62_v23  ;;  %404 = vmatpush3.bf16.msra.mxu1 %v403_v27 }
  0x5e   :  { %406 = vmatprep.subr.bf16.mxu1 %v405_v30 }
  0x61   :  { %408 = vmatpush3.bf16.msra.mxu1 %v407_v33 }
 0x130   :  { %v173_v41 = vpop.f32.mrb[0].mxu0 }
 0x131   :  { %v174_v42 = vadd.f32 %v173_v41, %v100_v39  ;;  %v175_v43 = vpop.f32.mrb[1].mxu0 }
 0x132   :  { %v176_v44 = vadd.f32 %v175_v43, %v104_v40 }
 0x133   :  { %v178_v46 = vmax.f32 %v174_v42, 0.0 }
 0x134   :  { %v179_v45 = vmax.f32 %v176_v44, 0.0 }
 0x136   :  { %283 = vmatprep.mubr.f32.mxu1 %v179_v45 }
 0x137   :  { %284 = vmatmul.mubr.f32.vlgmr.msra.gmra.mrb[0].mxu1 %v178_v46 }
 0x20a   :  { %v342_v47 = vpop.f32.mrb[0].mxu1 }
 0x20b   :  { %v343_v49 = vpop.f32.mrb[1].mxu1 }
 0x20c   :  { %v344_v50 = vadd.f32 %v343_v49, %v342_v47 }
 0x20e   :  { %v286_v51 = vadd.f32 %v344_v50, %v309_v48 }
 0x210   :  { %v289_v52 = vadd.f32 %v286_v51, %v62_v23 }
 0x212   :  { %290 = vst [vmem:[#allocation8] sm:$0xff] %v289_v52 }
 0x213   :  { %295 = vsyncadd [#allocation4], 64  ;;  %s524_s2 = smov [#allocation8]  }
 0x214   :  { %s296_s12 = sshll.u32 %s524_s2, 4  ;;  %s297_s12 = int_to_ptr.vmem [resolvable:$true] %s296_s12 }
 0x215   :  { %s486_s13 = scalar_lea.vmem %s297_s12, 64  ;;  %s490_s14 = scalar_lea.vmem %s297_s12, 128 }
 0x216   :  { %p487_p10 = scmp.ne.s32.totalorder %s297_s12, %s486_s13  ;;  %p491_p11 = scmp.lt.s32.totalorder %s297_s12, %s297_s12 }
 0x217   :  { %p492_p12 = scmp.lt.s32.totalorder %s490_s14, %s486_s13 }
 0x219   :  { %p493_p13 = por %p492_p12, %p491_p11 }
 0x21b   :  { %p494_p0 = pnand %p493_p13, %p487_p10 }
 0x21d   :  { %497 = shalt.err (!%p494_p0)
}
 0x21e   :  { %s498_s4 = scalar_lea.hbm %s620_s5, 64 }
 0x21f   :  { %p499_p1 = scmp.ne.s32.totalorder %s620_s5, %s498_s4  ;;  %p502_p2 = scmp.lt.u32.totalorder %s498_s4, %s620_s5 }
 0x221   :  { %p504_p3 = pnand %p502_p2, %p499_p1 }
 0x223   :  { %507 = shalt.err (!%p504_p3)
}
 0x224   :  { %302 = dma.vmem_to_hbm [thread:$0]  %s297_s12, 64, %s620_s5, [#allocation4], %s518_s17, %s518_s17, %s519_s18  }
 0x225   :  { %512 = dma.done.wait [#allocation4], 128  }
 0x226   :  { %513 = vsyncadd [#allocation4], 4294967168 }
 0x227   :  { %306 = vsyncpa [#allocation3], 1 }
 0x228   :  { %307 = vsyncpa [#allocation6], 1 }
 0x229   :  { %308 = vsyncpa [#allocation4], 1 }

</bundles_post_ra>
